<compile_context>
chip_gen: v7x
topology: tpu7x:2x2x1
jax: 0.10.0
libtpu: 0.0.40
codegen_flags: <defaults>
</compile_context>

<pallas_src>
import functools

import jax
import jax.numpy as jnp
from jax.experimental import pallas as pl
from jax.experimental.pallas import tpu as pltpu


def _round_up(v, m):
    return ((v + m - 1) // m) * m


def _pick_lane_tile(dim_p, cap):
    """Largest multiple of 128 that divides dim_p (a multiple of 128), <= cap."""
    best = 128
    for t in range(128, min(cap, dim_p) + 1, 128):
        if dim_p % t == 0:
            best = t
    return best


def _pick_sublane_tile(m, cap):
    """Pick tm (multiple of 8).  Prefer a divisor of round_up(m, 8) within
    [cap/2, cap] so M needs no extra padding; otherwise use cap and pad M."""
    m8 = _round_up(m, 8)
    cap = min(cap, m8)
    for t in range(cap, cap // 2, -8):
        if m8 % t == 0:
            return t
    return cap


def _linear_kernel(x_ref, w_ref, b_ref, o_ref):
    """One (tm, tn) output tile; K is the innermost (sequential) grid axis.

    The output block index ignores k, so o_ref stays resident in VMEM across
    the whole K loop: accumulate straight into it (f32 output -> no scratch).
    Bias is written exactly once, on the first K step.
    """
    k = pl.program_id(2)

    @pl.when(k == 0)
    def _():
        o_ref[...] = jnp.broadcast_to(
            b_ref[...].astype(o_ref.dtype), o_ref.shape
        )

    o_ref[...] += jnp.dot(
        x_ref[...], w_ref[...], preferred_element_type=jnp.float32
    )


@functools.partial(
    jax.jit, static_argnames=("out_size", "tm_cap", "tn_cap", "tk_cap")
)
def pallas_linear(x, w_t_pad, b_pad, *, out_size,
                  tm_cap=256, tn_cap=512, tk_cap=1024):
    """y = x @ w_t + b with pre-padded params.

    x:       (M, K)   activations (f32 or bf16)
    w_t_pad: (Kp, Np) weight, pre-padded to multiples of 128 at init
    b_pad:   (1, Np)  bias (f32), pre-padded at init
    Returns (M, out_size) f32.
    """
    M, K = x.shape
    Kp, Np = w_t_pad.shape
    assert Kp % 128 == 0 and Np % 128 == 0
    assert K <= Kp and out_size <= Np and b_pad.shape == (1, Np)

    # Tiles that exactly divide the (pre-)padded dims -> no K/N inflation.
    tm = _pick_sublane_tile(M, tm_cap)
    tk = _pick_lane_tile(Kp, tk_cap)
    tn = _pick_lane_tile(Np, tn_cap)
    Mp = _round_up(M, tm)

    # v7x has 2 TensorCores sharded over the "parallel" grid axes; if both M
    # and N collapse to one tile, split N so both cores get work (no-op on
    # single-TC v5e/v6e).
    if Mp // tm == 1 and Np // tn == 1 and Np >= 256:
        tn = _pick_lane_tile(Np, Np // 2)

    # Only the (small) activation is padded per call; weights/bias were padded
    # once at init, so the HBM-heavy operand is never re-copied here.
    if Mp == M and Kp == K:
        xp = x
    else:
        xp = jnp.pad(x, ((0, Mp - M), (0, Kp - K)))

    grid = (Mp // tm, Np // tn, Kp // tk)
    itemsize = jnp.dtype(x.dtype).itemsize

    out = pl.pallas_call(
        _linear_kernel,
        out_shape=jax.ShapeDtypeStruct((Mp, Np), jnp.float32),
        grid_spec=pltpu.PrefetchScalarGridSpec(
            num_scalar_prefetch=0,
            grid=grid,
            in_specs=[
                pl.BlockSpec((tm, tk), lambda i, j, k: (i, k)),
                # If profiling shows exposed DMA on the weight stream, add
                # pipeline_mode=pl.Buffered(3) here (watch VMEM on v7x).
                pl.BlockSpec((tk, tn), lambda i, j, k: (k, j)),
                pl.BlockSpec((1, tn), lambda i, j, k: (0, j)),
            ],
            out_specs=pl.BlockSpec((tm, tn), lambda i, j, k: (i, j)),
        ),
        compiler_params=pltpu.CompilerParams(
            # M / N tiles shard across TensorCores (v7x megacore); K is the
            # reduction axis and must stay sequential for the accumulation.
            dimension_semantics=("parallel", "parallel", "arbitrary"),
            # Conservative for v7x's 64 MiB/TC VMEM, still far above what the
            # double-buffered tiles need (<~8 MiB) and above v5e's 16 MiB
            # scoped default.
            vmem_limit_bytes=48 * 1024 * 1024,
        ),
        cost_estimate=pl.CostEstimate(
            flops=2 * Mp * Np * Kp,
            transcendentals=0,
            bytes_accessed=(
                itemsize * (Mp * Kp + Kp * Np) + 4 * (Mp * Np + Np)
            ),
        ),
    )(xp, w_t_pad, b_pad)

    return out[:M, :out_size]


class NetworkPallas:
    """JAX/Pallas port of `Network` (a single nn.Linear): y = x @ W.T + b."""

    # Below this FLOP count the call is pure launch/pad/slice overhead; the
    # XLA fused dot is strictly faster there.
    _SMALL_FLOPS = 2 * 128 * 128 * 128

    def __init__(self, in_size, out_size, key, compute_dtype=jnp.float32):
        k_w, k_b = jax.random.split(key)
        # Deterministic init mirroring nn.Linear's U(-1/sqrt(in), 1/sqrt(in)).
        bound = 1.0 / (in_size ** 0.5)
        # PyTorch stores weight as (out, in); keep it transposed as (in, out)
        # so the kernel is a plain row-major MXU matmul.
        w_t = jax.random.uniform(
            k_w, (in_size, out_size), jnp.float32, -bound, bound
        )
        b = jax.random.uniform(
            k_b, (1, out_size), jnp.float32, -bound, bound
        )

        self.in_size = in_size
        self.out_size = out_size
        self.compute_dtype = compute_dtype

        # Unpadded params for the tiny-shape fast path / reference math.
        self.w_t = w_t
        self.b = b

        # Pre-pad the HBM-heavy operands ONCE (lane-aligned to 128); the hot
        # path never re-pads them.  Weights optionally stored in bf16; bias
        # and accumulation stay f32.
        kp = _round_up(in_size, 128)
        np_ = _round_up(out_size, 128)
        self.w_t_pad = jnp.pad(
            w_t, ((0, kp - in_size), (0, np_ - out_size))
        ).astype(compute_dtype)
        self.b_pad = jnp.pad(b, ((0, 0), (0, np_ - out_size)))

    def __call__(self, x):
        M, K = x.shape
        assert K == self.in_size
        if 2 * M * K * self.out_size < self._SMALL_FLOPS:
            # Small-shape fast path: launch overhead dominates.
            return x @ self.w_t + self.b
        return pallas_linear(
            x.astype(self.compute_dtype),
            self.w_t_pad,
            self.b_pad,
            out_size=self.out_size,
        )


if __name__ == "__main__":
    key = jax.random.PRNGKey(0)
    k_x, k_p, k_x2, k_p2, k_x3, k_p3 = jax.random.split(key, 6)

    # --- Small shape implied by the module (batch=8, in=32, out=16) ---------
    batch, in_size, out_size = 8, 32, 16
    x = jax.random.normal(k_x, (batch, in_size), jnp.float32)
    net = NetworkPallas(in_size, out_size, k_p)
    y = jax.block_until_ready(net(x))            # fast path (jnp.dot)
    y_ref = x @ net.w_t + net.b
    assert y.shape == (batch, out_size)
    assert jnp.allclose(y, y_ref, atol=1e-5, rtol=1e-5)

    # Force the Pallas kernel on the same small shape to validate the
    # padded/tiled path itself.
    y_pallas = jax.block_until_ready(
        pallas_linear(x, net.w_t_pad, net.b_pad, out_size=out_size)
    )
    assert jnp.allclose(y_pallas, y_ref, atol=1e-5, rtol=1e-5)

    # --- Multi-tile shape: 256 x 384 -> 320 (non-multiple-of-128 N) ---------
    # Exercises divisor tile selection (tk=384), the N-split for v7x dual-TC
    # (grid becomes (1, 3, 1)), and the resident-output accumulation.
    net2 = NetworkPallas(384, 320, k_p2)
    x2 = jax.random.normal(k_x2, (256, 384), jnp.float32)
    y2 = jax.block_until_ready(net2(x2))
    y2_ref = x2 @ net2.w_t + net2.b
    assert jnp.allclose(y2, y2_ref, atol=1e-4, rtol=1e-4)

    # --- bf16 compute path (f32 accumulation / bias / output) ---------------
    net3 = NetworkPallas(512, 256, k_p3, compute_dtype=jnp.bfloat16)
    x3 = jax.random.normal(k_x3, (128, 512), jnp.float32)
    y3 = jax.block_until_ready(net3(x3))
    y3_ref = x3 @ net3.w_t + net3.b
    assert y3.dtype == jnp.float32
    assert jnp.allclose(y3, y3_ref, atol=5e-2, rtol=5e-2)

    print("KERNEL_OK")
</pallas_src>

<mosaic_0001>
module attributes {stable_mosaic.version = 11 : i64} {
  func.func @_linear_kernel(%arg0: i32, %arg1: i32, %arg2: i32, %arg3: memref<8x128xf32, #tpu.memory_space<vmem>>, %arg4: memref<128x128xf32, #tpu.memory_space<vmem>>, %arg5: memref<1x128xf32, #tpu.memory_space<vmem>>, %arg6: memref<8x128xf32, #tpu.memory_space<vmem>>) attributes {dimension_semantics = [#tpu.dimension_semantics<parallel>, #tpu.dimension_semantics<parallel>, #tpu.dimension_semantics<arbitrary>], iteration_bounds = array<i64: 1, 1, 1>, scalar_prefetch = 0 : i64, scratch_operands = 0 : i64, tpu.core_type = #tpu.core_type<tc>, window_params = [{transform_indices = @transform_0, window_bounds = array<i64: 8, 128>}, {transform_indices = @transform_1, window_bounds = array<i64: 128, 128>}, {transform_indices = @transform_2, window_bounds = array<i64: 1, 128>}, {transform_indices = @transform_3, window_bounds = array<i64: 8, 128>}]} {
    %c0_i32 = arith.constant 0 : i32
    %0 = arith.cmpi eq, %arg2, %c0_i32 : i32
    %1 = arith.extui %0 : i1 to i32
    %c0_i32_0 = arith.constant 0 : i32
    %2 = arith.cmpi ne, %1, %c0_i32_0 : i32
    scf.if %2 {
      %c0_8 = arith.constant 0 : index
      %c0_9 = arith.constant 0 : index
      %9 = vector.load %arg5[%c0_8, %c0_9] : memref<1x128xf32, #tpu.memory_space<vmem>>, vector<1x128xf32>
      %10 = vector.shape_cast %9 : vector<1x128xf32> to vector<1x128xf32>
      %11 = vector.broadcast %10 : vector<1x128xf32> to vector<8x128xf32>
      %c0_10 = arith.constant 0 : index
      %c0_11 = arith.constant 0 : index
      %12 = vector.load %arg6[%c0_10, %c0_11] : memref<8x128xf32, #tpu.memory_space<vmem>>, vector<8x128xf32>
      tpu.vector_store %arg6[%c0_10, %c0_11], %11 {strides = array<i32>} : memref<8x128xf32, #tpu.memory_space<vmem>>, vector<8x128xf32>,
    } else {
    }
    %c0 = arith.constant 0 : index
    %c0_1 = arith.constant 0 : index
    %3 = vector.load %arg6[%c0, %c0_1] : memref<8x128xf32, #tpu.memory_space<vmem>>, vector<8x128xf32>
    %c0_2 = arith.constant 0 : index
    %c0_3 = arith.constant 0 : index
    %4 = vector.load %arg3[%c0_2, %c0_3] : memref<8x128xf32, #tpu.memory_space<vmem>>, vector<8x128xf32>
    %c0_4 = arith.constant 0 : index
    %c0_5 = arith.constant 0 : index
    %5 = vector.load %arg4[%c0_4, %c0_5] : memref<128x128xf32, #tpu.memory_space<vmem>>, vector<128x128xf32>
    %cst = arith.constant dense<0.000000e+00> : vector<8x128xf32>
    %6 = tpu.matmul %4, %5, %cst {dimension_numbers = #tpu.dot_dimension_numbers<[1], [0], [0], [1], [0, 0, 1, 1], [], []>} : vector<8x128xf32>, vector<128x128xf32>, vector<8x128xf32> -> vector<8x128xf32>
    %7 = arith.addf %3, %6 : vector<8x128xf32>
    %c0_6 = arith.constant 0 : index
    %c0_7 = arith.constant 0 : index
    %8 = vector.load %arg6[%c0_6, %c0_7] : memref<8x128xf32, #tpu.memory_space<vmem>>, vector<8x128xf32>
    tpu.vector_store %arg6[%c0_6, %c0_7], %7 {strides = array<i32>} : memref<8x128xf32, #tpu.memory_space<vmem>>, vector<8x128xf32>,
    return
  }
  func.func @transform_0(%arg0: i32, %arg1: i32, %arg2: i32) -> (i32, i32) {
    %c0_i32 = arith.constant 0 : i32
    return %arg0, %arg2 : i32, i32
  }
  func.func @transform_1(%arg0: i32, %arg1: i32, %arg2: i32) -> (i32, i32) {
    %c0_i32 = arith.constant 0 : i32
    return %arg2, %arg1 : i32, i32
  }
  func.func @transform_2(%arg0: i32, %arg1: i32, %arg2: i32) -> (i32, i32) {
    %c0_i32 = arith.constant 0 : i32
    %c0_i32_0 = arith.constant 0 : i32
    return %c0_i32, %arg1 : i32, i32
  }
  func.func @transform_3(%arg0: i32, %arg1: i32, %arg2: i32) -> (i32, i32) {
    %c0_i32 = arith.constant 0 : i32
    return %arg0, %arg1 : i32, i32
  }
}

</mosaic_0001>

<bundles_post_ra>
// kernel: pallas_linear.1
= control target key start
LH: loop header
LB: loop body
LE: loop exit
PB: predicated region body
PF: predicated region fallthrough
CT: control target
= control target key end

     0   :  { %8 = vsyncpa [#allocation3], 0  ;;  %s335_s0 = inlined_call_operand.vmem [shape: f32[8,128], index: 0, kind: input, shape index: {}]   ;;  %s336_s1 = inlined_call_operand.hbm [shape: f32[128,128], index: 1, kind: input, shape index: {}]   ;;  %s337_s2 = inlined_call_operand.vmem [shape: f32[1,128], index: 2, kind: input, shape index: {}]   ;;  %s338_s3 = inlined_call_operand.hbm [shape: f32[8,128], index: 3, kind: output, shape index: {}]  }
   0x1   :  { %9 = vsyncpa [#allocation4], 0  ;;  %s278_s12 = smov [#allocation2]   ;;  %s230_s16 = scalar_lea.hbm %s336_s1, 2048 }
   0x2   :  { %s17_s13 = sshll.u32 %s278_s12, 4  ;;  %p231_p0 = scmp.ne.s32.totalorder %s336_s1, %s230_s16  ;;  %s18_s13 = int_to_ptr.vmem [resolvable:$true] %s17_s13 }
   0x3   :  { %p234_p1 = scmp.lt.u32.totalorder %s230_s16, %s336_s1 }
   0x5   :  { %p236_p2 = pnand %p234_p1, %p231_p0 }
   0x7   :  { %239 = shalt.err (!%p236_p2)
}
   0x8   :  { %s240_s21 = scalar_lea.vmem %s18_s13, 2048  ;;  %p245_p4 = scmp.lt.s32.totalorder %s18_s13, %s18_s13 }
   0x9   :  { %p241_p3 = scmp.ne.s32.totalorder %s18_s13, %s240_s21  ;;  %p246_p5 = scmp.lt.s32.totalorder %s240_s21, %s240_s21 }
   0xb   :  { %p247_p6 = por %p246_p5, %p245_p4 }
   0xd   :  { %p248_p7 = pnand %p247_p6, %p241_p3 }
   0xf   :  { %251 = shalt.err (!%p248_p7)
}
  0x10   :  { %s279_s22 = smov 128   ;;  %s280_s23 = smov 8  }
  0x11   :  { %23 = dma.hbm_to_vmem [thread:$0]  %s336_s1, 2048, %s18_s13, [#allocation3], %s279_s22, %s279_s22, %s280_s23  }
  0x12   :  { %274 = dma.done.wait [#allocation3], 2048  }
  0x13   :  { %275 = vsyncadd [#allocation3], 4294965248  ;;  %v281_v0 = vmov 0.0|0.0   ;;  %vm282_vm0 = vmmov 0   ;;  %v283_v1 = vmov 0.0   ;;  %v43_v2 = vld [vmem:[#allocation2] sm:$0xff] }
  0x14   :  { %199 = vmatprep.subr.bf16.mxu0 %v281_v0  ;;  %196 = vmatprep.mubr.msk.f32.mxu0 %vm282_vm0, %v283_v1  ;;  %v44_v3 = vld [vmem:[#allocation2 + $0x8] sm:$0xff]  ;;  %v45_v4 = vld [vmem:[#allocation2 + $0x10] sm:$0xff]  ;;  %v46_v6 = vld [vmem:[#allocation2 + $0x18] sm:$0xff]  ;;  %s284_s29 = smov [#allocation5]  }
  0x15   :  { %v200_v5 = vpack.c.bf16 %v44_v3, %v43_v2  ;;  %v203_v7 = vpack.c.bf16 %v46_v6, %v45_v4  ;;  %v47_v8 = vld [vmem:[#allocation2 + $0x20] sm:$0xff]  ;;  %v48_v9 = vld [vmem:[#allocation2 + $0x28] sm:$0xff]  ;;  %v49_v11 = vld [vmem:[#allocation2 + $0x30] sm:$0xff]  ;;  %s137_s30 = sshll.u32 %s284_s29, 4  ;;  %s138_s30 = int_to_ptr.vmem [resolvable:$true] %s137_s30 }
  0x16   :  { %v206_v10 = vpack.c.bf16 %v48_v9, %v47_v8  ;;  %v50_v12 = vld [vmem:[#allocation2 + $0x38] sm:$0xff]  ;;  %v51_v14 = vld [vmem:[#allocation2 + $0x40] sm:$0xff]  ;;  %v52_v15 = vld [vmem:[#allocation2 + $0x48] sm:$0xff]  ;;  %s252_s4 = scalar_lea.vmem %s138_s30, 128  ;;  %p257_p9 = scmp.lt.s32.totalorder %s138_s30, %s138_s30 }
  0x17   :  { %201 = vmatpush3.bf16.msra.mxu0 %v200_v5  ;;  %v209_v13 = vpack.c.bf16 %v50_v12, %v49_v11  ;;  %v212_v16 = vpack.c.bf16 %v52_v15, %v51_v14  ;;  %v53_v17 = vld [vmem:[#allocation2 + $0x50] sm:$0xff]  ;;  %v54_v18 = vld [vmem:[#allocation2 + $0x58] sm:$0xff]  ;;  %v55_v20 = vld [vmem:[#allocation2 + $0x60] sm:$0xff]  ;;  %p253_p8 = scmp.ne.s32.totalorder %s138_s30, %s252_s4  ;;  %p258_p10 = scmp.lt.s32.totalorder %s252_s4, %s252_s4 }
  0x18   :  { %202 = vmatprep.subr.bf16.mxu0 %v281_v0  ;;  %v215_v19 = vpack.c.bf16 %v54_v18, %v53_v17  ;;  %v56_v21 = vld [vmem:[#allocation2 + $0x68] sm:$0xff]  ;;  %v57_v23 = vld [vmem:[#allocation2 + $0x70] sm:$0xff]  ;;  %v58_v24 = vld [vmem:[#allocation2 + $0x78] sm:$0xff] }
  0x19   :  { %v218_v22 = vpack.c.bf16 %v56_v21, %v55_v20  ;;  %v221_v25 = vpack.c.bf16 %v58_v24, %v57_v23  ;;  %v42_v26 = vld [vmem:[%s335_s0] sm:$0xff]  ;;  %p259_p11 = por %p258_p10, %p257_p9 }
  0x1a   :  { %v146_v27 = vld [vmem:[%s337_s2] ss:$0 sm:$0xff] }
  0x1b   :  { %204 = vmatpush3.bf16.msra.mxu0 %v203_v7  ;;  %p260_p12 = pnand %p259_p11, %p253_p8 }
  0x1c   :  { %205 = vmatprep.subr.bf16.mxu0 %v281_v0 }
  0x1f   :  { %207 = vmatpush3.bf16.msra.mxu0 %v206_v10 }
  0x20   :  { %208 = vmatprep.subr.bf16.mxu0 %v281_v0 }
  0x23   :  { %210 = vmatpush3.bf16.msra.mxu0 %v209_v13 }
  0x24   :  { %211 = vmatprep.subr.bf16.mxu0 %v281_v0 }
  0x27   :  { %213 = vmatpush3.bf16.msra.mxu0 %v212_v16 }
  0x28   :  { %214 = vmatprep.subr.bf16.mxu0 %v281_v0 }
  0x2b   :  { %216 = vmatpush3.bf16.msra.mxu0 %v215_v19 }
  0x2c   :  { %217 = vmatprep.subr.bf16.mxu0 %v281_v0 }
  0x2f   :  { %219 = vmatpush3.bf16.msra.mxu0 %v218_v22 }
  0x30   :  { %220 = vmatprep.subr.bf16.mxu0 %v281_v0 }
  0x33   :  { %222 = vmatpush3.bf16.msra.mxu0 %v221_v25 }
  0x36   :  { %197 = vmatmul.mubr.f32.vlgmr.msra.gmra.mrb[0].mxu0 %v42_v26 }
 0x109   :  { %v125_v28 = vpop.f32.mrb[0].mxu0 }
 0x10a   :  { %v129_v29 = vadd.f32 %v146_v27, %v125_v28  ;;  %v198_v30 = vpop.f32.mrb[1].mxu0 }
 0x10c   :  { %130 = vst [vmem:[#allocation5] sm:$0xff] %v129_v29 }
 0x10d   :  { %263 = shalt.err (!%p260_p12)
}
 0x10e   :  { %s264_s6 = scalar_lea.hbm %s338_s3, 128 }
 0x10f   :  { %p265_p13 = scmp.ne.s32.totalorder %s338_s3, %s264_s6  ;;  %p268_p0 = scmp.lt.u32.totalorder %s264_s6, %s338_s3 }
 0x111   :  { %p270_p1 = pnand %p268_p0, %p265_p13 }
 0x113   :  { %273 = shalt.err (!%p270_p1)
}
 0x114   :  { %140 = dma.vmem_to_hbm [thread:$0]  %s138_s30, 128, %s338_s3, [#allocation4]  }
 0x115   :  { %276 = dma.done.wait [#allocation4], 128  }
 0x116   :  { %277 = vsyncadd [#allocation4], 4294967168 }
 0x117   :  { %144 = vsyncpa [#allocation3], 1 }
 0x118   :  { %145 = vsyncpa [#allocation4], 1 }

</bundles_post_ra>
